<compile_context>
chip_gen: v5e
topology: v5e:2x2
jax: 0.10.0
libtpu: 0.0.40
codegen_flags: <defaults>
</compile_context>

<pallas_src>
import jax
import jax.numpy as jnp
from jax.experimental import pallas as pl
from jax.experimental.pallas import tpu as pltpu

# DMA-chunking knobs: one DMA already saturates HBM bandwidth for a memcpy;
# for big tensors a handful of chunks lets descriptor issue latency overlap.
_MAX_CHUNKS = 4
_CHUNK_THRESHOLD_BYTES = 4 << 20  # only split tensors >= 4 MiB


def _make_hbm_memcpy_kernel(chunk_bounds, leading_extent):
    """Kernel factory: direct HBM->HBM DMA copy of x into o.

    chunk_bounds: static tuple of (start, stop) ranges along dim 0.
    """

    def kernel(x_hbm, o_hbm, sems):
        copies = []
        for idx, (start, stop) in enumerate(chunk_bounds):
            if start == 0 and stop == leading_extent:
                src, dst = x_hbm, o_hbm            # full-ref copy, no slicing
            else:
                src = x_hbm.at[start:stop]         # static slice: zero-cost view
                dst = o_hbm.at[start:stop]
            cp = pltpu.make_async_copy(src, dst, sems.at[idx])
            cp.start()
            copies.append(cp)
        for cp in copies:
            cp.wait()

    return kernel


def _memcpy_pallas(x: jax.Array) -> jax.Array:
    """Identity copy of `x` as a pure HBM->HBM DMA (no VMEM staging)."""
    rows = x.shape[0]
    nbytes = x.size * jnp.dtype(x.dtype).itemsize

    if nbytes >= _CHUNK_THRESHOLD_BYTES and rows >= 2:
        num_chunks = min(_MAX_CHUNKS, rows)
    else:
        num_chunks = 1

    # Even static split of the leading dim into `num_chunks` ranges.
    base, rem = divmod(rows, num_chunks)
    bounds = []
    start = 0
    for i in range(num_chunks):
        stop = start + base + (1 if i < rem else 0)
        bounds.append((start, stop))
        start = stop

    return pl.pallas_call(
        _make_hbm_memcpy_kernel(tuple(bounds), rows),
        out_shape=jax.ShapeDtypeStruct(x.shape, x.dtype),
        in_specs=[pl.BlockSpec(memory_space=pl.ANY)],   # raw HBM ref, no auto-DMA
        out_specs=pl.BlockSpec(memory_space=pl.ANY),    # raw HBM ref, no auto-DMA
        scratch_shapes=[pltpu.SemaphoreType.DMA((num_chunks,))],
    )(x)


def relu_pynq_forward(x: jax.Array) -> jax.Array:
    """Forward pass of Relu_pynq / RPYNQ: output = input.clone().

    Works for any shape/dtype (e.g. NCHW activations); no lane-multiple
    requirement because the copy never stages through VMEM.
    """
    if x.size == 0:
        return jnp.copy(x)  # nothing to move
    if x.ndim == 0:
        return _memcpy_pallas(x.reshape(1)).reshape(())
    return _memcpy_pallas(x)


if __name__ == "__main__":
    key = jax.random.PRNGKey(0)
    # NCHW input, small shapes: batch=2, channels=4, spatial=16x16
    x = jax.random.normal(key, (2, 4, 16, 16), dtype=jnp.float32)

    y = relu_pynq_forward(x)
    jax.block_until_ready(y)

    # Forward is an identity copy — verify exact match.
    assert y.shape == x.shape and y.dtype == x.dtype
    assert bool(jnp.all(y == x))

    print("KERNEL_OK")
</pallas_src>

<mosaic_0001>
module attributes {stable_mosaic.version = 11 : i64} {
  func.func @kernel(%arg0: memref<2x4x16x16xf32, #tpu.memory_space<any>>, %arg1: memref<2x4x16x16xf32, #tpu.memory_space<any>>, %arg2: memref<1x!tpu.dma_semaphore, #tpu.memory_space<semaphore_mem>>) attributes {dimension_semantics = [], scalar_prefetch = 0 : i64, scratch_operands = 1 : i64, tpu.core_type = #tpu.core_type<tc>} {
    %c0_i32 = arith.constant 0 : i32
    %0 = tpu.memref_slice %arg2[%c0_i32] : memref<1x!tpu.dma_semaphore, #tpu.memory_space<semaphore_mem>> -> memref<1x!tpu.dma_semaphore, #tpu.memory_space<semaphore_mem>>
    %1 = tpu.memref_squeeze %0 : memref<1x!tpu.dma_semaphore, #tpu.memory_space<semaphore_mem>> -> memref<!tpu.dma_semaphore, #tpu.memory_space<semaphore_mem>>
    tpu.enqueue_dma source(%arg0 : memref<2x4x16x16xf32, #tpu.memory_space<any>>) target(%arg1 : memref<2x4x16x16xf32, #tpu.memory_space<any>>) target_semaphore(%1 : memref<!tpu.dma_semaphore, #tpu.memory_space<semaphore_mem>>)
    %c0_i32_0 = arith.constant 0 : i32
    %2 = tpu.memref_slice %arg2[%c0_i32_0] : memref<1x!tpu.dma_semaphore, #tpu.memory_space<semaphore_mem>> -> memref<1x!tpu.dma_semaphore, #tpu.memory_space<semaphore_mem>>
    %3 = tpu.memref_squeeze %2 : memref<1x!tpu.dma_semaphore, #tpu.memory_space<semaphore_mem>> -> memref<!tpu.dma_semaphore, #tpu.memory_space<semaphore_mem>>
    tpu.wait_dma2 semaphore(%3 : memref<!tpu.dma_semaphore, #tpu.memory_space<semaphore_mem>>) src(%arg0 : memref<2x4x16x16xf32, #tpu.memory_space<any>>) dst(%arg1 : memref<2x4x16x16xf32, #tpu.memory_space<any>>)
    return
  }
}

</mosaic_0001>

<bundles_post_ra>
// kernel: tpu_custom_call.1
= control target key start
LH: loop header
LB: loop body
LE: loop exit
PB: predicated region body
PF: predicated region fallthrough
CT: control target
= control target key end

     0   :  { %s34_s12 = smov [#allocation2]   ;;  %s35_s13 = smov [#allocation3]   ;;  %s53_s0 = inlined_call_operand.hbm [shape: f32[2,4,16,16], index: 0, kind: input, shape index: {}]   ;;  %s54_s1 = inlined_call_operand.hbm [shape: f32[2,4,16,16], index: 1, kind: output, shape index: {}]  }
   0x1   :  { %s10_s8 = sshll.u32 %s53_s0, 4  ;;  %s12_s11 = sshll.u32 %s54_s1, 4  ;;  %s11_s8 = int_to_ptr.hbm [resolvable:$true] %s10_s8  ;;  %s13_s11 = int_to_ptr.hbm [resolvable:$true] %s12_s11 }
   0x2   :  { %s36_s14 = smov 0  }
   0x3   :  { %16 = dma.general %s11_s8, 2048, %s13_s11, %s34_s12, %s35_s13, [#allocation4], %s36_s14, 0  }
   0x4   :  { %32 = dma.done.wait [#allocation2], 2048 }
   0x5   :  { %33 = vsyncadd [#allocation2], 4294965248 }
   0x6   :  { %22 = vsyncmov [#allocation2] }
   0x9   :  { %s23_s15 = vpop.sfrf %22 }
   0xa   :  { %p28_p0 = scmp.ne.s32.totalorder %s23_s15, 0 }
   0xc   :  { %27 = shalt.err (%p28_p0)  }

</bundles_post_ra>
